<compile_context>
chip_gen: v6e
topology: v6e:2x2x1
jax: 0.10.0
libtpu: 0.0.40
codegen_flags: <defaults>
</compile_context>

<pallas_src>
import functools
import math

import jax
import jax.numpy as jnp
from jax.experimental import pallas as pl
from jax.experimental.pallas import tpu as pltpu  # noqa: F401  (kept for TPU-specific tuning hooks)

NEG_SLOPE = 0.2
BN_EPS = 1e-5
MASK_BIAS = -1e30


def _elu(x):
    # exp only on the non-positive side to avoid dead-lane overflow.
    return jnp.where(x > 0.0, x, jnp.exp(jnp.minimum(x, 0.0)) - 1.0)


# ----------------------------------------------------------------------------
# Fused GAT layer kernel:
#   fc -> per-head masked-softmax attention -> (residual) -> (inner ELU)
#      -> *snorm_n -> BatchNorm1d (batch stats) -> ELU
# ----------------------------------------------------------------------------
def _gat_layer_kernel(h_ref, w_ref, al_ref, ar_ref, adjb_ref, snorm_ref,
                      gamma_ref, beta_ref, o_ref, *,
                      heads, out_feats, residual, inner_elu,
                      negative_slope, eps):
    h_in = h_ref[...]                                        # (N, Din)
    feat = jnp.dot(h_in, w_ref[...],
                   preferred_element_type=jnp.float32)       # (N, H*F)  fc, no bias
    fl = feat * al_ref[...]                                  # (N, H*F)
    fr = feat * ar_ref[...]
    adj_bias = adjb_ref[...]                                 # (N_dst, N_src): 0 / -1e30

    outs = []
    for hd in range(heads):                                  # unrolled at trace time
        lo, hi = hd * out_feats, (hd + 1) * out_feats
        feat_h = feat[:, lo:hi]                              # (N, F)
        el = jnp.sum(fl[:, lo:hi], axis=-1, keepdims=True)   # (N, 1) source score
        er = jnp.sum(fr[:, lo:hi], axis=-1, keepdims=True)   # (N, 1) dest score
        s = er + jnp.transpose(el)                           # (N_dst, N_src)
        s = jnp.where(s >= 0.0, s, negative_slope * s)       # leaky_relu
        s = s + adj_bias                                     # mask non-edges
        s_max = jnp.max(s, axis=-1, keepdims=True)
        p = jnp.exp(s - s_max)                               # masked lanes -> 0
        denom = jnp.sum(p, axis=-1, keepdims=True)
        inv = pl.reciprocal(denom, approx=True)              # EUP slot
        inv = inv * (2.0 - denom * inv)                      # 1 Newton step -> ~f32 exact
        alpha = p * inv                                      # edge_softmax
        outs.append(jnp.dot(alpha, feat_h,
                            preferred_element_type=jnp.float32))
    rst = jnp.concatenate(outs, axis=-1)                     # (N, H*F), lane-dense

    if residual:
        rst = rst + h_in                                     # identity res_fc (Din == H*F)
    if inner_elu:
        rst = _elu(rst)                                      # GATConv activation (ELU)
    x = rst * snorm_ref[...]                                 # h * snorm_n
    mean = jnp.mean(x, axis=0, keepdims=True)                # BatchNorm1d, batch stats
    var = jnp.mean((x - mean) ** 2, axis=0, keepdims=True)
    y = (x - mean) * jax.lax.rsqrt(var + eps)
    y = y * gamma_ref[...] + beta_ref[...]
    o_ref[...] = _elu(y).astype(o_ref.dtype)                 # self.activation (ELU)


def gat_layer(h, fc_w, attn_l, attn_r, adj_bias, snorm_n, gamma, beta, *,
              heads, out_feats, residual, inner_elu):
    n, din = h.shape
    d_out = heads * out_feats
    flops = (2 * n * din * d_out
             + heads * (2 * n * n * out_feats + 8 * n * n + 4 * n * out_feats)
             + 12 * n * d_out)
    transcendentals = heads * n * n + 2 * n * d_out + d_out + heads * n
    bytes_accessed = 4 * (n * din + din * d_out + 2 * d_out + n * n
                          + n + 2 * d_out + n * d_out)
    return pl.pallas_call(
        functools.partial(_gat_layer_kernel, heads=heads, out_feats=out_feats,
                          residual=residual, inner_elu=inner_elu,
                          negative_slope=NEG_SLOPE, eps=BN_EPS),
        out_shape=jax.ShapeDtypeStruct((n, d_out), jnp.float32),
        cost_estimate=pl.CostEstimate(flops=flops,
                                      transcendentals=transcendentals,
                                      bytes_accessed=bytes_accessed),
    )(h, fc_w, attn_l.reshape(1, d_out), attn_r.reshape(1, d_out),
      adj_bias, snorm_n, gamma, beta)


# ----------------------------------------------------------------------------
# Fused classifier kernel: relu(h @ W1 + b1) @ W2 + b2
# ----------------------------------------------------------------------------
def _classifier_kernel(h_ref, w1_ref, b1_ref, w2_ref, b2_ref, o_ref):
    h1 = jnp.dot(h_ref[...], w1_ref[...], preferred_element_type=jnp.float32)
    h1 = jnp.maximum(h1 + b1_ref[...], 0.0)                  # classifier1 + relu
    o_ref[...] = (jnp.dot(h1, w2_ref[...], preferred_element_type=jnp.float32)
                  + b2_ref[...]).astype(o_ref.dtype)         # classifier2


def classifier(h, w1, b1, w2, b2):
    n, d = h.shape
    dh, c = w1.shape[1], w2.shape[1]
    flops = 2 * n * d * dh + 2 * n * dh * c + 2 * n * (dh + c)
    bytes_accessed = 4 * (n * d + d * dh + dh + dh * c + c + n * c)
    return pl.pallas_call(
        _classifier_kernel,
        out_shape=jax.ShapeDtypeStruct((n, c), jnp.float32),
        cost_estimate=pl.CostEstimate(flops=flops, transcendentals=0,
                                      bytes_accessed=bytes_accessed),
    )(h, w1, b1.reshape(1, dh), w2, b2.reshape(1, c))


# ----------------------------------------------------------------------------
# Parameter init (deterministic, synthetic)
# ----------------------------------------------------------------------------
def init_params(key, *, vocab=200, in_dim=32, num_hidden=16, heads=(2, 2), n_cls=2):
    num_layers = len(heads)
    keys = iter(jax.random.split(key, 4 * num_layers + 5))

    def rnd(shape):
        return 0.1 * jax.random.normal(next(keys), shape, jnp.float32)

    params = {"embed": rnd((vocab, in_dim)), "layers": []}
    din = in_dim
    for l in range(num_layers):
        h, f = heads[l], num_hidden
        params["layers"].append(dict(
            fc_w=rnd((din, h * f)),
            attn_l=rnd((h, f)),
            attn_r=rnd((h, f)),
            bn_gamma=jnp.ones((1, h * f), jnp.float32),
            bn_beta=jnp.zeros((1, h * f), jnp.float32),
            heads=h, out_feats=f,
            residual=(l > 0),        # first layer residual=False, rest True (identity)
            inner_act=(l > 0),       # first layer activation=None, rest ELU
        ))
        din = h * f
    hidden_dim = num_hidden * heads[-2]
    params["cls1_w"] = rnd((hidden_dim, hidden_dim // 2))
    params["cls1_b"] = jnp.zeros((hidden_dim // 2,), jnp.float32)
    params["cls2_w"] = rnd((hidden_dim // 2, n_cls))
    params["cls2_b"] = jnp.zeros((n_cls,), jnp.float32)
    return params


# ----------------------------------------------------------------------------
# Forward
# ----------------------------------------------------------------------------
def gatsbm_forward(params, x_ids, adj, snorm_n):
    # Embedding lookup (data-dependent gather) kept in plain JAX glue.
    h = jnp.take(params["embed"], x_ids, axis=0)                   # (N, in_dim)
    # Head- and layer-independent additive mask bias, computed once per forward.
    adj_bias = jnp.where(adj > 0.0, 0.0, MASK_BIAS).astype(jnp.float32)
    for lp in params["layers"]:
        h = gat_layer(h, lp["fc_w"], lp["attn_l"], lp["attn_r"], adj_bias,
                      snorm_n, lp["bn_gamma"], lp["bn_beta"],
                      heads=lp["heads"], out_feats=lp["out_feats"],
                      residual=lp["residual"], inner_elu=lp["inner_act"])
    return classifier(h, params["cls1_w"], params["cls1_b"],
                      params["cls2_w"], params["cls2_b"])


# ----------------------------------------------------------------------------
if __name__ == "__main__":
    key = jax.random.PRNGKey(0)
    k_param, k_x, k_adj = jax.random.split(key, 3)

    N = 16            # nodes in the (small) graph
    IN_DIM = 32
    NUM_HIDDEN = 16
    HEADS = (2, 2)    # num_layers = 2
    N_CLS = 2

    params = init_params(k_param, in_dim=IN_DIM, num_hidden=NUM_HIDDEN,
                         heads=HEADS, n_cls=N_CLS)

    x_ids = jax.random.randint(k_x, (N,), 0, 200)                  # node-label ids
    adj_rand = (jax.random.uniform(k_adj, (N, N)) < 0.3).astype(jnp.float32)
    adj = jnp.maximum(adj_rand, jnp.eye(N, dtype=jnp.float32))     # add self-loops
    snorm_n = jnp.full((N, 1), 1.0 / math.sqrt(N), jnp.float32)    # node norm factor
    # snorm_e / e are unused by the reference forward.
    # TODO(synk): if N is ever scaled up (>~2k), tile adj over the source dim with
    # an online softmax and pad lane dims to 128 instead of full-array blocks.

    logits = gatsbm_forward(params, x_ids, adj, snorm_n)
    jax.block_until_ready(logits)
    assert logits.shape == (N, N_CLS)
    print("KERNEL_OK")
</pallas_src>

<mosaic_0001>
module attributes {stable_mosaic.version = 11 : i64} {
  func.func @_gat_layer_kernel(%arg0: memref<16x32xf32, #tpu.memory_space<vmem>>, %arg1: memref<32x32xf32, #tpu.memory_space<vmem>>, %arg2: memref<1x32xf32, #tpu.memory_space<vmem>>, %arg3: memref<1x32xf32, #tpu.memory_space<vmem>>, %arg4: memref<16x16xf32, #tpu.memory_space<vmem>>, %arg5: memref<16x1xf32, #tpu.memory_space<vmem>>, %arg6: memref<1x32xf32, #tpu.memory_space<vmem>>, %arg7: memref<1x32xf32, #tpu.memory_space<vmem>>, %arg8: memref<16x32xf32, #tpu.memory_space<vmem>>) attributes {dimension_semantics = [], scalar_prefetch = 0 : i64, scratch_operands = 0 : i64, tpu.core_type = #tpu.core_type<tc>} {
    %c0 = arith.constant 0 : index
    %c0_0 = arith.constant 0 : index
    %0 = vector.load %arg0[%c0, %c0_0] : memref<16x32xf32, #tpu.memory_space<vmem>>, vector<16x32xf32>
    %c0_1 = arith.constant 0 : index
    %c0_2 = arith.constant 0 : index
    %1 = vector.load %arg1[%c0_1, %c0_2] : memref<32x32xf32, #tpu.memory_space<vmem>>, vector<32x32xf32>
    %cst = arith.constant dense<0.000000e+00> : vector<16x32xf32>
    %2 = tpu.matmul %0, %1, %cst {dimension_numbers = #tpu.dot_dimension_numbers<[1], [0], [0], [1], [0, 0, 1, 1], [], []>} : vector<16x32xf32>, vector<32x32xf32>, vector<16x32xf32> -> vector<16x32xf32>
    %c0_3 = arith.constant 0 : index
    %c0_4 = arith.constant 0 : index
    %3 = vector.load %arg2[%c0_3, %c0_4] : memref<1x32xf32, #tpu.memory_space<vmem>>, vector<1x32xf32>
    %4 = vector.broadcast %3 : vector<1x32xf32> to vector<16x32xf32>
    %5 = arith.mulf %2, %4 : vector<16x32xf32>
    %c0_5 = arith.constant 0 : index
    %c0_6 = arith.constant 0 : index
    %6 = vector.load %arg3[%c0_5, %c0_6] : memref<1x32xf32, #tpu.memory_space<vmem>>, vector<1x32xf32>
    %7 = vector.broadcast %6 : vector<1x32xf32> to vector<16x32xf32>
    %8 = arith.mulf %2, %7 : vector<16x32xf32>
    %c0_7 = arith.constant 0 : index
    %c0_8 = arith.constant 0 : index
    %9 = vector.load %arg4[%c0_7, %c0_8] : memref<16x16xf32, #tpu.memory_space<vmem>>, vector<16x16xf32>
    %10 = vector.extract_strided_slice %2 {offsets = [0, 0], sizes = [16, 16], strides = [1, 1]} : vector<16x32xf32> to vector<16x16xf32>
    %11 = vector.extract_strided_slice %5 {offsets = [0, 0], sizes = [16, 16], strides = [1, 1]} : vector<16x32xf32> to vector<16x16xf32>
    %cst_9 = arith.constant dense<0.000000e+00> : vector<16xf32>
    %12 = vector.multi_reduction <add>, %11, %cst_9 [1] : vector<16x16xf32> to vector<16xf32>
    %13 = vector.shape_cast %12 : vector<16xf32> to vector<16x1xf32>
    %14 = vector.extract_strided_slice %8 {offsets = [0, 0], sizes = [16, 16], strides = [1, 1]} : vector<16x32xf32> to vector<16x16xf32>
    %cst_10 = arith.constant dense<0.000000e+00> : vector<16xf32>
    %15 = vector.multi_reduction <add>, %14, %cst_10 [1] : vector<16x16xf32> to vector<16xf32>
    %16 = vector.shape_cast %15 : vector<16xf32> to vector<16x1xf32>
    %17 = tpu.transpose %13, [1, 0] : vector<16x1xf32> -> vector<1x16xf32>
    %18 = vector.broadcast %16 : vector<16x1xf32> to vector<16x16xf32>
    %19 = vector.broadcast %17 : vector<1x16xf32> to vector<16x16xf32>
    %20 = arith.addf %18, %19 : vector<16x16xf32>
    %cst_11 = arith.constant 0.000000e+00 : f32
    %21 = vector.broadcast %cst_11 : f32 to vector<16x16xf32>
    %22 = arith.cmpf oge, %20, %21 : vector<16x16xf32>
    %cst_12 = arith.constant 2.000000e-01 : f32
    %23 = vector.broadcast %cst_12 : f32 to vector<16x16xf32>
    %24 = arith.mulf %23, %20 : vector<16x16xf32>
    %25 = arith.select %22, %20, %24 : vector<16x16xi1>, vector<16x16xf32>
    %26 = arith.addf %25, %9 : vector<16x16xf32>
    %cst_13 = arith.constant dense<0xFF800000> : vector<16xf32>
    %27 = vector.multi_reduction <maximumf>, %26, %cst_13 [1] : vector<16x16xf32> to vector<16xf32>
    %28 = vector.shape_cast %27 : vector<16xf32> to vector<16x1xf32>
    %29 = vector.broadcast %28 : vector<16x1xf32> to vector<16x16xf32>
    %30 = arith.subf %26, %29 : vector<16x16xf32>
    %31 = math.exp %30 : vector<16x16xf32>
    %cst_14 = arith.constant dense<0.000000e+00> : vector<16xf32>
    %32 = vector.multi_reduction <add>, %31, %cst_14 [1] : vector<16x16xf32> to vector<16xf32>
    %33 = vector.shape_cast %32 : vector<16xf32> to vector<16x1xf32>
    %34 = tpu.reciprocal %33 {approx = true} : vector<16x1xf32> -> vector<16x1xf32>
    %35 = arith.mulf %33, %34 : vector<16x1xf32>
    %cst_15 = arith.constant 2.000000e+00 : f32
    %36 = vector.broadcast %cst_15 : f32 to vector<16x1xf32>
    %37 = arith.subf %36, %35 : vector<16x1xf32>
    %38 = arith.mulf %34, %37 : vector<16x1xf32>
    %39 = vector.broadcast %38 : vector<16x1xf32> to vector<16x16xf32>
    %40 = arith.mulf %31, %39 : vector<16x16xf32>
    %cst_16 = arith.constant dense<0.000000e+00> : vector<16x16xf32>
    %41 = tpu.matmul %40, %10, %cst_16 {dimension_numbers = #tpu.dot_dimension_numbers<[1], [0], [0], [1], [0, 0, 1, 1], [], []>} : vector<16x16xf32>, vector<16x16xf32>, vector<16x16xf32> -> vector<16x16xf32>
    %42 = vector.extract_strided_slice %2 {offsets = [0, 16], sizes = [16, 16], strides = [1, 1]} : vector<16x32xf32> to vector<16x16xf32>
    %43 = vector.extract_strided_slice %5 {offsets = [0, 16], sizes = [16, 16], strides = [1, 1]} : vector<16x32xf32> to vector<16x16xf32>
    %cst_17 = arith.constant dense<0.000000e+00> : vector<16xf32>
    %44 = vector.multi_reduction <add>, %43, %cst_17 [1] : vector<16x16xf32> to vector<16xf32>
    %45 = vector.shape_cast %44 : vector<16xf32> to vector<16x1xf32>
    %46 = vector.extract_strided_slice %8 {offsets = [0, 16], sizes = [16, 16], strides = [1, 1]} : vector<16x32xf32> to vector<16x16xf32>
    %cst_18 = arith.constant dense<0.000000e+00> : vector<16xf32>
    %47 = vector.multi_reduction <add>, %46, %cst_18 [1] : vector<16x16xf32> to vector<16xf32>
    %48 = vector.shape_cast %47 : vector<16xf32> to vector<16x1xf32>
    %49 = tpu.transpose %45, [1, 0] : vector<16x1xf32> -> vector<1x16xf32>
    %50 = vector.broadcast %48 : vector<16x1xf32> to vector<16x16xf32>
    %51 = vector.broadcast %49 : vector<1x16xf32> to vector<16x16xf32>
    %52 = arith.addf %50, %51 : vector<16x16xf32>
    %cst_19 = arith.constant 0.000000e+00 : f32
    %53 = vector.broadcast %cst_19 : f32 to vector<16x16xf32>
    %54 = arith.cmpf oge, %52, %53 : vector<16x16xf32>
    %cst_20 = arith.constant 2.000000e-01 : f32
    %55 = vector.broadcast %cst_20 : f32 to vector<16x16xf32>
    %56 = arith.mulf %55, %52 : vector<16x16xf32>
    %57 = arith.select %54, %52, %56 : vector<16x16xi1>, vector<16x16xf32>
    %58 = arith.addf %57, %9 : vector<16x16xf32>
    %cst_21 = arith.constant dense<0xFF800000> : vector<16xf32>
    %59 = vector.multi_reduction <maximumf>, %58, %cst_21 [1] : vector<16x16xf32> to vector<16xf32>
    %60 = vector.shape_cast %59 : vector<16xf32> to vector<16x1xf32>
    %61 = vector.broadcast %60 : vector<16x1xf32> to vector<16x16xf32>
    %62 = arith.subf %58, %61 : vector<16x16xf32>
    %63 = math.exp %62 : vector<16x16xf32>
    %cst_22 = arith.constant dense<0.000000e+00> : vector<16xf32>
    %64 = vector.multi_reduction <add>, %63, %cst_22 [1] : vector<16x16xf32> to vector<16xf32>
    %65 = vector.shape_cast %64 : vector<16xf32> to vector<16x1xf32>
    %66 = tpu.reciprocal %65 {approx = true} : vector<16x1xf32> -> vector<16x1xf32>
    %67 = arith.mulf %65, %66 : vector<16x1xf32>
    %cst_23 = arith.constant 2.000000e+00 : f32
    %68 = vector.broadcast %cst_23 : f32 to vector<16x1xf32>
    %69 = arith.subf %68, %67 : vector<16x1xf32>
    %70 = arith.mulf %66, %69 : vector<16x1xf32>
    %71 = vector.broadcast %70 : vector<16x1xf32> to vector<16x16xf32>
    %72 = arith.mulf %63, %71 : vector<16x16xf32>
    %cst_24 = arith.constant dense<0.000000e+00> : vector<16x16xf32>
    %73 = tpu.matmul %72, %42, %cst_24 {dimension_numbers = #tpu.dot_dimension_numbers<[1], [0], [0], [1], [0, 0, 1, 1], [], []>} : vector<16x16xf32>, vector<16x16xf32>, vector<16x16xf32> -> vector<16x16xf32>
    %74 = tpu.concatenate %41, %73 in 1 : vector<16x16xf32>, vector<16x16xf32> -> vector<16x32xf32>
    %c0_25 = arith.constant 0 : index
    %c0_26 = arith.constant 0 : index
    %75 = vector.load %arg5[%c0_25, %c0_26] : memref<16x1xf32, #tpu.memory_space<vmem>>, vector<16x1xf32>
    %76 = vector.broadcast %75 : vector<16x1xf32> to vector<16x32xf32>
    %77 = arith.mulf %74, %76 : vector<16x32xf32>
    %cst_27 = arith.constant dense<0.000000e+00> : vector<32xf32>
    %78 = vector.multi_reduction <add>, %77, %cst_27 [0] : vector<16x32xf32> to vector<32xf32>
    %79 = vector.shape_cast %78 : vector<32xf32> to vector<1x32xf32>
    %cst_28 = arith.constant 1.600000e+01 : f32
    %80 = vector.broadcast %cst_28 : f32 to vector<1x32xf32>
    %81 = arith.divf %79, %80 : vector<1x32xf32>
    %82 = vector.broadcast %81 : vector<1x32xf32> to vector<16x32xf32>
    %83 = arith.subf %77, %82 : vector<16x32xf32>
    %84 = arith.mulf %83, %83 : vector<16x32xf32>
    %cst_29 = arith.constant dense<0.000000e+00> : vector<32xf32>
    %85 = vector.multi_reduction <add>, %84, %cst_29 [0] : vector<16x32xf32> to vector<32xf32>
    %86 = vector.shape_cast %85 : vector<32xf32> to vector<1x32xf32>
    %cst_30 = arith.constant 1.600000e+01 : f32
    %87 = vector.broadcast %cst_30 : f32 to vector<1x32xf32>
    %88 = arith.divf %86, %87 : vector<1x32xf32>
    %89 = vector.broadcast %81 : vector<1x32xf32> to vector<16x32xf32>
    %90 = arith.subf %77, %89 : vector<16x32xf32>
    %cst_31 = arith.constant 9.99999974E-6 : f32
    %91 = vector.broadcast %cst_31 : f32 to vector<1x32xf32>
    %92 = arith.addf %88, %91 : vector<1x32xf32>
    %93 = math.rsqrt %92 : vector<1x32xf32>
    %94 = vector.broadcast %93 : vector<1x32xf32> to vector<16x32xf32>
    %95 = arith.mulf %90, %94 : vector<16x32xf32>
    %c0_32 = arith.constant 0 : index
    %c0_33 = arith.constant 0 : index
    %96 = vector.load %arg6[%c0_32, %c0_33] : memref<1x32xf32, #tpu.memory_space<vmem>>, vector<1x32xf32>
    %97 = vector.broadcast %96 : vector<1x32xf32> to vector<16x32xf32>
    %98 = arith.mulf %95, %97 : vector<16x32xf32>
    %c0_34 = arith.constant 0 : index
    %c0_35 = arith.constant 0 : index
    %99 = vector.load %arg7[%c0_34, %c0_35] : memref<1x32xf32, #tpu.memory_space<vmem>>, vector<1x32xf32>
    %100 = vector.broadcast %99 : vector<1x32xf32> to vector<16x32xf32>
    %101 = arith.addf %98, %100 : vector<16x32xf32>
    %cst_36 = arith.constant 0.000000e+00 : f32
    %102 = vector.broadcast %cst_36 : f32 to vector<16x32xf32>
    %103 = arith.cmpf ogt, %101, %102 : vector<16x32xf32>
    %cst_37 = arith.constant 0.000000e+00 : f32
    %104 = vector.broadcast %cst_37 : f32 to vector<16x32xf32>
    %105 = arith.minimumf %101, %104 : vector<16x32xf32>
    %106 = math.exp %105 : vector<16x32xf32>
    %cst_38 = arith.constant 1.000000e+00 : f32
    %107 = vector.broadcast %cst_38 : f32 to vector<16x32xf32>
    %108 = arith.subf %106, %107 : vector<16x32xf32>
    %109 = arith.select %103, %101, %108 : vector<16x32xi1>, vector<16x32xf32>
    %c0_39 = arith.constant 0 : index
    %c0_40 = arith.constant 0 : index
    %110 = vector.load %arg8[%c0_39, %c0_40] : memref<16x32xf32, #tpu.memory_space<vmem>>, vector<16x32xf32>
    tpu.vector_store %arg8[%c0_39, %c0_40], %109 {strides = array<i32>} : memref<16x32xf32, #tpu.memory_space<vmem>>, vector<16x32xf32>,
    return
  }
}

</mosaic_0001>

<bundles_post_ra>
// kernel: tpu_custom_call.1
= control target key start
LH: loop header
LB: loop body
LE: loop exit
PB: predicated region body
PF: predicated region fallthrough
CT: control target
= control target key end

     0   :  { %13 = vsyncpa [#allocation3], 0  ;;  %s923_s0 = inlined_call_operand.vmem [shape: f32[16,32], index: 0, kind: input, shape index: {}]   ;;  %s924_s1 = inlined_call_operand.hbm [shape: f32[32,32], index: 1, kind: input, shape index: {}]   ;;  %s925_s2 = inlined_call_operand.vmem [shape: f32[1,32], index: 2, kind: input, shape index: {}]   ;;  %s926_s3 = inlined_call_operand.vmem [shape: f32[1,32], index: 3, kind: input, shape index: {}]   ;;  %s927_s4 = inlined_call_operand.hbm [shape: f32[16,16], index: 4, kind: input, shape index: {}]   ;;  %s928_s5 = inlined_call_operand.vmem [shape: f32[16,1], index: 5, kind: input, shape index: {}]   ;;  %s929_s6 = inlined_call_operand.vmem [shape: f32[1,32], index: 6, kind: input, shape index: {}]   ;;  %s930_s7 = inlined_call_operand.vmem [shape: f32[1,32], index: 7, kind: input, shape index: {}]   ;;  %s931_s8 = inlined_call_operand.hbm [shape: f32[16,32], index: 8, kind: output, shape index: {}]  }
   0x1   :  { %14 = vsyncpa [#allocation6], 0 }
   0x2   :  { %15 = vsyncpa [#allocation4], 0  ;;  %s778_s27 = smov [#allocation2]  }
   0x3   :  { %s23_s28 = sshll.u32 %s778_s27, 4  ;;  %s24_s28 = int_to_ptr.vmem [resolvable:$true] %s23_s28 }
   0x4   :  { %s720_s29 = scalar_lea.vmem %s24_s28, 512  ;;  %p725_p1 = scmp.lt.s32.totalorder %s24_s28, %s24_s28 }
   0x5   :  { %p721_p0 = scmp.ne.s32.totalorder %s24_s28, %s720_s29  ;;  %p726_p2 = scmp.lt.s32.totalorder %s720_s29, %s720_s29 }
   0x7   :  { %p727_p3 = por %p726_p2, %p725_p1 }
   0x9   :  { %p728_p4 = pnand %p727_p3, %p721_p0 }
   0xb   :  { %731 = shalt.err (!%p728_p4)
}
   0xc   :  { %s779_s30 = smov 128   ;;  %s780_s9 = smov 8  }
   0xd   :  { %29 = dma.hbm_to_vmem [thread:$0]  %s924_s1, 512, %s24_s28, [#allocation3], %s779_s30, %s779_s30, %s780_s9  }
   0xe   :  { %s781_s12 = smov [#allocation5]  }
   0xf   :  { %s39_s13 = sshll.u32 %s781_s12, 4  ;;  %s40_s13 = int_to_ptr.vmem [resolvable:$true] %s39_s13 }
  0x10   :  { %s740_s14 = scalar_lea.vmem %s40_s13, 256  ;;  %p745_p6 = scmp.lt.s32.totalorder %s40_s13, %s40_s13 }
  0x11   :  { %p741_p5 = scmp.ne.s32.totalorder %s40_s13, %s740_s14  ;;  %p746_p7 = scmp.lt.s32.totalorder %s740_s14, %s740_s14 }
  0x13   :  { %p747_p8 = por %p746_p7, %p745_p6 }
  0x15   :  { %p748_p9 = pnand %p747_p8, %p741_p5 }
  0x17   :  { %751 = shalt.err (!%p748_p9)
}
  0x18   :  { %45 = dma.hbm_to_vmem [thread:$0]  %s927_s4, 256, %s40_s13, [#allocation6], %s779_s30, %s779_s30, %s780_s9  }
  0x19   :  { %772 = dma.done.wait [#allocation3], 512  }
  0x1a   :  { %773 = vsyncadd [#allocation3], 4294966784 }
  0x1b   :  { %774 = dma.done.wait [#allocation6], 256  }
  0x1c   :  { %775 = vsyncadd [#allocation6], 4294967040  ;;  %vm64_vm0 = vcmask 261120   ;;  %v63_v0 = vld [vmem:[#allocation2 + $0x18] sm:$0xff]  ;;  %v62_v1 = vld [vmem:[#allocation2 + $0x10] sm:$0xff]  ;;  %vm166_vm1 = vcmask 130048   ;;  %v211_v28 = vlaneseq }
  0x1d   :  { %654 = vmatprep.subr.mxu0 %v63_v0  ;;  %v58_v2 = vld [vmem:[%s923_s0] sm:$0xff]  ;;  %v61_v3 = vld [vmem:[#allocation2 + $0x8] sm:$0xff]  ;;  %s785_s29 = smov [#allocation7]  }
  0x1e   :  { %655 = vmatpush3.msra.mxu0 %v63_v0  ;;  %662 = vmatprep.mubr.msk.f32.mxu0 %vm64_vm0, %v58_v2  ;;  %v60_v4 = vld [vmem:[#allocation2] sm:$0xff]  ;;  %v59_v5 = vld [vmem:[%s923_s0 + $0x8] sm:$0xff]  ;;  %s782_s0 = smov 112   ;;  %v212_v31 = vshrl.u32 %v211_v28, 7  ;;  %s615_s10 = sshll.u32 %s785_s29, 4  ;;  %s616_s10 = int_to_ptr.vmem [resolvable:$true] %s615_s10 }
  0x1f   :  { %656 = vmatprep.subr.mxu0 %v62_v1  ;;  %v631_v8 = vld [vmem:[%s926_s3] ss:$0 sm:$0xff]  ;;  %v165_v41 = vld [vmem:[#allocation5 + $0x8] sm:$0xff]  ;;  %p757_p11 = scmp.lt.s32.totalorder %s616_s10, %s616_s10 }
  0x20   :  { %657 = vmatpush3.msra.mxu0 %v62_v1  ;;  %v630_v9 = vld [vmem:[%s925_s2] ss:$0 sm:$0xff]  ;;  %v213_v34 = vsub.s32 0, %v212_v31 }
  0x21   :  { %658 = vmatprep.subr.mxu0 %v61_v3  ;;  %v164_v40 = vld [vmem:[#allocation5] sm:$0xff] }
  0x22   :  { %659 = vmatpush3.msra.mxu0 %v61_v3 }
  0x23   :  { %660 = vmatprep.subr.mxu0 %v60_v4 }
  0x24   :  { %661 = vmatpush3.msra.mxu0 %v60_v4 }
  0x25   :  { %663 = vmatmul.mubr.msk.f32.vlgmr.msra.gmra.mxu0 %vm64_vm0, %v59_v5 }
  0xe5   :  { %v851_v6 = vpop.f32.mrf.mxu0 }
  0xe6   :  { %665 = vmatprep.subr.mxu1 %v851_v6  ;;  %v163_v12 = vmul.f32 %v851_v6, %v631_v8  ;;  %v154_v13 = vmul.f32 %v851_v6, %v630_v9 }
  0xe7   :  { %v854_v7 = vpop.f32.mrf.mxu0  ;;  %666 = vmatpush3.msra.mxu1 %v851_v6 }
  0xe8   :  { %667 = vmatprep.subr.mxu1 %v854_v7  ;;  %v162_v10 = vmul.f32 %v631_v8, %v854_v7  ;;  %v153_v11 = vmul.f32 %v630_v9, %v854_v7  ;;  %v170_v15 = vsel %vm166_vm1, %v154_v13, 0.0  ;;  %v176_v23 = vsel %vm166_vm1, %v163_v12, 0.0 }
  0xe9   :  { %668 = vmatpush3.msra.mxu1 %v854_v7 }
  0xea   :  { %350 = vrot.lane.b32.xlu1 %v162_v10, %s782_s0  ;;  %336 = vrot.lane.b32.xlu0 %v153_v11, %s782_s0  ;;  %v167_v14 = vsel %vm166_vm1, %v153_v11, 0.0  ;;  %v173_v16 = vsel %vm166_vm1, %v162_v10, 0.0 }
  0xee   :  { %352 = vrot.lane.b32.xlu1 %v163_v12, %s782_s0  ;;  %338 = vrot.lane.b32.xlu0 %v154_v13, %s782_s0 }
 0x10d   :  { %168 = vadd.xlane.f32.xlu0 %v167_v14 }
 0x112   :  { %171 = vadd.xlane.f32.xlu1 %v170_v15 }
 0x116   :  { %174 = vadd.xlane.f32.xlu1 %v173_v16 }
 0x15c   :  { %v351_v17 = vpop.permute.xlu1 %350  ;;  %v337_v18 = vpop.permute.xlu0 %336 }
 0x15d   :  { %v356_v19 = vsel %vm166_vm1, %v351_v17, 0.0  ;;  %v342_v20 = vsel %vm166_vm1, %v337_v18, 0.0 }
 0x15e   :  { %357 = vadd.xlane.f32.xlu1 %v356_v19  ;;  %343 = vadd.xlane.f32.xlu0 %v342_v20 }
 0x160   :  { %v339_v21 = vpop.permute.xlu0 %338  ;;  %v353_v24 = vpop.permute.xlu1 %352 }
 0x161   :  { %v345_v22 = vsel %vm166_vm1, %v339_v21, 0.0  ;;  %v359_v25 = vsel %vm166_vm1, %v353_v24, 0.0 }
 0x162   :  { %346 = vadd.xlane.f32.xlu0 %v345_v22 }
 0x166   :  { %177 = vadd.xlane.f32.xlu0 %v176_v23 }
 0x16a   :  { %360 = vadd.xlane.f32.xlu0 %v359_v25 }
 0x196   :  { %v169_v26 = vpop.xlane.xlu0 %168 }
 0x197   :  { %179 = vxpose.xlu1.b32.start [1/2] (short) (narrow) %v169_v26, 8 }
 0x19b   :  { %v172_v27 = vpop.xlane.xlu1 %171 }
 0x19c   :  { %180 = vxpose.xlu1.b32.end [2/2] (short) (narrow) %v172_v27, 8 }
 0x19f   :  { %v175_v30 = vpop.xlane.xlu1 %174 }
 0x1e7   :  { %v344_v29 = vpop.xlane.xlu0 %343  ;;  %v358_v32 = vpop.xlane.xlu1 %357 }
 0x1eb   :  { %v347_v33 = vpop.xlane.xlu0 %346 }
 0x1ef   :  { %v178_v37 = vpop.xlane.xlu0 %177 }
 0x1f3   :  { %v361_v50 = vpop.xlane.xlu0 %360 }
 0x214   :  { %v195_v35 = vpop.trf.xlu1 }
 0x215   :  { %v214_v36 = vrot.slane %v195_v35, %v213_v34  ;;  %v536_v35 = vld [vmem:[%s928_s5 + $0x8] sm:$0xff] }
 0x217   :  { %v215_v38 = vadd.f32 %v214_v36, %v175_v30  ;;  %v216_v39 = vadd.f32 %v214_v36, %v178_v37 }
 0x219   :  { %v219_v42 = vmul.f32 0.2, %v215_v38  ;;  %v220_v43 = vmul.f32 0.2, %v216_v39  ;;  %vm217_vm2 = vcmp.ge.f32.partialorder %v215_v38, 0.0  ;;  %vm218_vm3 = vcmp.ge.f32.partialorder %v216_v39, 0.0 }
 0x21b   :  { %v221_v44 = vsel %vm217_vm2, %v215_v38, %v219_v42  ;;  %v222_v45 = vsel %vm218_vm3, %v216_v39, %v220_v43 }
 0x21c   :  { %v223_v46 = vadd.f32 %v221_v44, %v164_v40  ;;  %v224_v47 = vadd.f32 %v222_v45, %v165_v41 }
 0x21e   :  { %v225_v48 = vsel %vm166_vm1, %v223_v46, -inf  ;;  %v228_v49 = vsel %vm166_vm1, %v224_v47, -inf }
 0x21f   :  { %226 = vmax.xlane.f32.xlu0 %v225_v48  ;;  %229 = vmax.xlane.f32.xlu1 %v228_v49 }
 0x24c   :  { %362 = vxpose.xlu0.b32.start [1/2] (short) (narrow) %v344_v29, 8 }
 0x250   :  { %363 = vxpose.xlu0.b32.end [2/2] (short) (narrow) %v347_v33, 8  ;;  %v535_v33 = vld [vmem:[%s928_s5] sm:$0xff]  ;;  %s784_s5 = smov 16  }
 0x2a8   :  { %v230_v51 = vpop.xlane.xlu1 %229  ;;  %v227_v52 = vpop.xlane.xlu0 %226 }
 0x2a9   :  { %v232_v53 = vsub.f32 %v224_v47, %v230_v51  ;;  %v231_v54 = vsub.f32 %v223_v46, %v227_v52 }
 0x2ab   :  { %v235_v55 = vmul.f32 1.442695, %v232_v53  ;;  %v233_v56 = vmul.f32 1.442695, %v231_v54 }
 0x2ad   :  { %690 = vpow2.f32 %v235_v55 }
 0x2ae   :  { %692 = vpow2.f32 %v233_v56 }
 0x2ba   :  { %v691_v3 = vpop.eup %690 }
 0x2bb   :  { %v693_v8 = vpop.eup %692  ;;  %v240_v9 = vsel %vm166_vm1, %v691_v3, 0.0 }
 0x2bc   :  { %v237_v10 = vsel %vm166_vm1, %v693_v8, 0.0 }
 0x2c8   :  { %v378_v57 = vpop.trf.xlu0 }
 0x2c9   :  { %v397_v58 = vrot.slane %v378_v57, %v213_v34  ;;  %v783_v34 = vmov 0  }
 0x2ca   :  { %688 = vset.pattern.permute.xlu1 %v783_v34  ;;  %689 = vset.pattern.permute.xlu0 %v783_v34 }
 0x2cb   :  { %v398_v59 = vadd.f32 %v397_v58, %v358_v32  ;;  %v399_v60 = vadd.f32 %v397_v58, %v361_v50 }
 0x2cd   :  { %v402_v61 = vmul.f32 0.2, %v398_v59  ;;  %v403_v62 = vmul.f32 0.2, %v399_v60  ;;  %vm401_vm4 = vcmp.ge.f32.partialorder %v399_v60, 0.0  ;;  %vm400_vm5 = vcmp.ge.f32.partialorder %v398_v59, 0.0 }
 0x2cf   :  { %v405_v63 = vsel %vm401_vm4, %v399_v60, %v403_v62  ;;  %v404_v0 = vsel %vm400_vm5, %v398_v59, %v402_v61 }
 0x2d0   :  { %v407_v1 = vadd.f32 %v405_v63, %v165_v41  ;;  %v406_v2 = vadd.f32 %v404_v0, %v164_v40 }
 0x2d2   :  { %v411_v4 = vsel %vm166_vm1, %v407_v1, -inf  ;;  %v408_v5 = vsel %vm166_vm1, %v406_v2, -inf }
 0x2d3   :  { %412 = vmax.xlane.f32.xlu0 %v411_v4  ;;  %409 = vmax.xlane.f32.xlu1 %v408_v5 }
 0x2d7   :  { %241 = vadd.xlane.f32.xlu0 %v240_v9  ;;  %238 = vadd.xlane.f32.xlu1 %v237_v10 }
 0x35c   :  { %v413_v11 = vpop.xlane.xlu0 %412  ;;  %v410_v12 = vpop.xlane.xlu1 %409 }
 0x35d   :  { %v415_v13 = vsub.f32 %v407_v1, %v413_v11  ;;  %v414_v14 = vsub.f32 %v406_v2, %v410_v12 }
 0x35f   :  { %v418_v15 = vmul.f32 1.442695, %v415_v13  ;;  %v416_v16 = vmul.f32 1.442695, %v414_v14 }
 0x360   :  { %v242_v17 = vpop.xlane.xlu0 %241  ;;  %v239_v18 = vpop.xlane.xlu1 %238 }
 0x361   :  { %694 = vpow2.f32 %v418_v15 }
 0x362   :  { %696 = vpow2.f32 %v416_v16 }
 0x363   :  { %698 = vrcp.f32 %v242_v17 }
 0x364   :  { %700 = vrcp.f32 %v239_v18 }
 0x36e   :  { %v695_v19 = vpop.eup %694 }
 0x36f   :  { %v697_v20 = vpop.eup %696  ;;  %v423_v21 = vsel %vm166_vm1, %v695_v19, 0.0 }
 0x370   :  { %v699_v22 = vpop.eup %698  ;;  %424 = vadd.xlane.f32.xlu0 %v423_v21  ;;  %v420_v23 = vsel %vm166_vm1, %v697_v20, 0.0 }
 0x371   :  { %v701_v24 = vpop.eup %700  ;;  %v246_v25 = vmul.f32 %v699_v22, %v242_v17  ;;  %421 = vadd.xlane.f32.xlu1 %v420_v23 }
 0x372   :  { %v245_v26 = vmul.f32 %v701_v24, %v239_v18 }
 0x373   :  { %v248_v27 = vsub.f32 2.0, %v246_v25 }
 0x374   :  { %v247_v28 = vsub.f32 2.0, %v245_v26 }
 0x375   :  { %v250_v29 = vmul.f32 %v699_v22, %v248_v27  ;;  %v637_v27 = vld [vmem:[%s930_s7] ss:$0 sm:$0xff] }
 0x376   :  { %v249_v30 = vmul.f32 %v701_v24, %v247_v28  ;;  %v636_v24 = vld [vmem:[%s929_s6] ss:$0 sm:$0xff]  ;;  %s752_s6 = scalar_lea.vmem %s616_s10, 256 }
 0x377   :  { %v252_v31 = vmul.f32 %v691_v3, %v250_v29  ;;  %p753_p10 = scmp.ne.s32.totalorder %s616_s10, %s752_s6  ;;  %p758_p12 = scmp.lt.s32.totalorder %s752_s6, %s752_s6 }
 0x378   :  { %v251_v32 = vmul.f32 %v693_v8, %v249_v30 }
 0x379   :  { %p759_p13 = por %p758_p12, %p757_p11 }
 0x37a   :  { %669 = vmatprep.mubr.msk.f32.mxu1 %vm166_vm1, %v251_v32 }
 0x37b   :  { %670 = vmatmul.mubr.msk.f32.vlgmr.msra.gmra.mxu1 %vm166_vm1, %v252_v31  ;;  %p760_p0 = pnand %p759_p13, %p753_p10 }
 0x382   :  { %440 = vrot.lane.b32.xlu1 %v851_v6, %s782_s0 }
 0x386   :  { %438 = vrot.lane.b32.xlu0 %v854_v7, %s782_s0  ;;  %539 = vperm.xlu1 %688, %v535_v33  }
 0x38a   :  { %544 = vperm.xlu1 %688, %v536_v35  }
 0x3f9   :  { %v425_v36 = vpop.xlane.xlu0 %424 }
 0x3fa   :  { %702 = vrcp.f32 %v425_v36  ;;  %v422_v37 = vpop.xlane.xlu1 %421 }
 0x3fb   :  { %704 = vrcp.f32 %v422_v37 }
 0x3fd   :  { %v439_v7 = vpop.permute.xlu0 %438 }
 0x3fe   :  { %v441_v6 = vpop.permute.xlu1 %440 }
 0x3ff   :  { %672 = vmatprep.subr.mxu1 %v441_v6 }
 0x400   :  { %673 = vmatpush3.msra.mxu1 %v441_v6 }
 0x401   :  { %674 = vmatprep.subr.mxu1 %v439_v7 }
 0x402   :  { %675 = vmatpush3.msra.mxu1 %v439_v7  ;;  %v540_v52 = vpop.permute.xlu1 %539 }
 0x406   :  { %v545_v53 = vpop.permute.xlu1 %544 }
 0x407   :  { %v703_v38 = vpop.eup %702 }
 0x408   :  { %v705_v39 = vpop.eup %704  ;;  %v429_v40 = vmul.f32 %v703_v38, %v425_v36 }
 0x409   :  { %v428_v41 = vmul.f32 %v705_v39, %v422_v37 }
 0x40a   :  { %v431_v42 = vsub.f32 2.0, %v429_v40 }
 0x40b   :  { %v430_v43 = vsub.f32 2.0, %v428_v41 }
 0x40c   :  { %v433_v44 = vmul.f32 %v703_v38, %v431_v42 }
 0x40d   :  { %v432_v45 = vmul.f32 %v705_v39, %v430_v43 }
 0x40e   :  { %v435_v46 = vmul.f32 %v695_v19, %v433_v44 }
 0x40f   :  { %v434_v47 = vmul.f32 %v697_v20, %v432_v45 }
 0x411   :  { %676 = vmatprep.mubr.msk.f32.mxu1 %vm166_vm1, %v434_v47 }
 0x412   :  { %677 = vmatmul.mubr.msk.f32.vlgmr.msra.gmra.mxu1 %vm166_vm1, %v435_v46 }
 0x43b   :  { %v671_v48 = vpop.f32.mrf.mxu1 }
 0x43d   :  { %v325_v49 = vpop.f32.mrf.mxu1 }
 0x4d2   :  { %v678_v50 = vpop.f32.mrf.mxu1 }
 0x4d3   :  { %529 = vrot.lane.b32.xlu1 %v678_v50, %s784_s5 }
 0x4d4   :  { %v516_v51 = vpop.f32.mrf.mxu1 }
 0x4d5   :  { %527 = vrot.lane.b32.xlu0 %v516_v51, %s784_s5 }
 0x545   :  { %v530_v54 = vpop.permute.xlu1 %529 }
 0x546   :  { %v534_v55 = vsel %vm166_vm1, %v671_v48, %v530_v54 }
 0x547   :  { %v548_v56 = vmul.f32 %v545_v53, %v534_v55  ;;  %v528_v57 = vpop.permute.xlu0 %527 }
 0x548   :  { %v533_v58 = vsel %vm166_vm1, %v325_v49, %v528_v57 }
 0x549   :  { %v547_v59 = vmul.f32 %v540_v52, %v533_v58  ;;  %v550_v60 = vsel %vm64_vm0, %v548_v56, 0.0 }
 0x54b   :  { %v549_v61 = vsel %vm64_vm0, %v547_v59, 0.0 }
 0x54c   :  { %v551_v62 = vadd.f32 %v550_v60, %v549_v61 }
 0x54e   :  { %v552_v63 = vrot.slane %v551_v62, 4 }
 0x550   :  { %v553_v0 = vadd.f32 %v552_v63, %v551_v62 }
 0x552   :  { %v554_v1 = vrot.slane %v553_v0, 2 }
 0x554   :  { %v555_v2 = vadd.f32 %v554_v1, %v553_v0 }
 0x556   :  { %v556_v3 = vrot.slane %v555_v2, 1 }
 0x558   :  { %v557_v4 = vadd.f32 %v556_v3, %v555_v2 }
 0x55a   :  { %v559_v5 = vmul.f32 0.0625, %v557_v4 }
 0x55c   :  { %v560_v8 = vsub.f32 %v547_v59, %v559_v5  ;;  %v561_v9 = vsub.f32 %v548_v56, %v559_v5 }
 0x55e   :  { %v562_v10 = vmul.f32 %v560_v8, %v560_v8  ;;  %v563_v11 = vmul.f32 %v561_v9, %v561_v9 }
 0x560   :  { %v564_v12 = vsel %vm64_vm0, %v562_v10, 0.0  ;;  %v565_v13 = vsel %vm64_vm0, %v563_v11, 0.0 }
 0x561   :  { %v566_v14 = vadd.f32 %v565_v13, %v564_v12 }
 0x563   :  { %v567_v15 = vrot.slane %v566_v14, 4 }
 0x565   :  { %v568_v16 = vadd.f32 %v567_v15, %v566_v14 }
 0x567   :  { %v569_v17 = vrot.slane %v568_v16, 2 }
 0x569   :  { %v570_v18 = vadd.f32 %v569_v17, %v568_v16 }
 0x56b   :  { %v571_v19 = vrot.slane %v570_v18, 1 }
 0x56d   :  { %v572_v20 = vadd.f32 %v571_v19, %v570_v18 }
 0x56f   :  { %v573_v21 = vmul.f32 0.0625, %v572_v20 }
 0x571   :  { %v574_v22 = vadd.f32 1e-05, %v573_v21 }
 0x573   :  { %706 = vrsqrt.f32 %v574_v22 }
 0x580   :  { %v707_v23 = vpop.eup %706 }
 0x581   :  { %v576_v25 = vmul.f32 %v707_v23, %v560_v8  ;;  %v577_v26 = vmul.f32 %v707_v23, %v561_v9 }
 0x583   :  { %v585_v28 = vmul.f32 %v636_v24, %v576_v25  ;;  %v586_v29 = vmul.f32 %v636_v24, %v577_v26 }
 0x585   :  { %v594_v30 = vadd.f32 %v637_v27, %v585_v28  ;;  %v595_v31 = vadd.f32 %v637_v27, %v586_v29 }
 0x587   :  { %v598_v32 = vmin.f32 %v594_v30, 0.0  ;;  %v599_v33 = vmin.f32 %v595_v31, 0.0  ;;  %vm596_vm6 = vcmp.gt.f32.partialorder %v594_v30, 0.0  ;;  %vm597_vm7 = vcmp.gt.f32.partialorder %v595_v31, 0.0 }
 0x589   :  { %v600_v34 = vmul.f32 1.442695, %v598_v32  ;;  %v602_v35 = vmul.f32 1.442695, %v599_v33 }
 0x58b   :  { %708 = vpow2.f32 %v600_v34 }
 0x58c   :  { %710 = vpow2.f32 %v602_v35 }
 0x598   :  { %v709_v36 = vpop.eup %708 }
 0x599   :  { %v711_v37 = vpop.eup %710  ;;  %v638_v6 = vadd.f32 -1.0, %v709_v36 }
 0x59a   :  { %v639_v7 = vadd.f32 -1.0, %v711_v37 }
 0x59b   :  { %v606_v38 = vsel %vm596_vm6, %v594_v30, %v638_v6 }
 0x59c   :  { %v607_v39 = vsel %vm597_vm7, %v595_v31, %v639_v7  ;;  %608 = vst.msk [vmem:[#allocation7] sm:$0xff] %vm64_vm0, %v606_v38 }
 0x59d   :  { %609 = vst.msk [vmem:[#allocation7 + $0x8] sm:$0xff] %vm64_vm0, %v607_v39 }
 0x59e   :  { %763 = shalt.err (!%p760_p0)
}
 0x59f   :  { %621 = dma.vmem_to_hbm [thread:$0]  %s616_s10, 256, %s931_s8, [#allocation4], %s779_s30, %s779_s30, %s780_s9  }
 0x5a0   :  { %776 = dma.done.wait [#allocation4], 256  }
 0x5a1   :  { %777 = vsyncadd [#allocation4], 4294967040 }
 0x5a2   :  { %625 = vsyncpa [#allocation3], 1 }
 0x5a3   :  { %626 = vsyncpa [#allocation6], 1 }
 0x5a4   :  { %627 = vsyncpa [#allocation4], 1 }

</bundles_post_ra>
